<compile_context>
chip_gen: v5e
topology: v5e:2x2
jax: 0.10.0
libtpu: 0.0.40
codegen_flags: <defaults>
</compile_context>

<pallas_src>
import functools
import math

import jax
import jax.numpy as jnp
from jax.experimental import pallas as pl
from jax.experimental.pallas import tpu as pltpu


# ---------------------------------------------------------------------------
# Weight construction (plain-JAX glue) -- mirrors bicubic_imresize.contribute
# ---------------------------------------------------------------------------
def _cubic(x):
    absx = jnp.abs(x)
    absx2 = absx * absx
    absx3 = absx2 * absx
    cond1 = (absx <= 1).astype(jnp.float32)
    cond2 = ((absx > 1) & (absx <= 2)).astype(jnp.float32)
    return (1.5 * absx3 - 2.5 * absx2 + 1) * cond1 + \
           (-0.5 * absx3 + 2.5 * absx2 - 4 * absx + 2) * cond2


def _contribute_1d(in_size, out_size, scale):
    kernel_width = 4.0
    if scale < 1:
        kernel_width = 4.0 / scale
    x = jnp.arange(1, out_size + 1, dtype=jnp.float32)
    u = x / scale + 0.5 * (1.0 - 1.0 / scale)
    left = jnp.floor(u - kernel_width / 2.0)
    P = int(math.ceil(kernel_width) + 2)
    indice = left[:, None] + jnp.arange(P, dtype=jnp.float32)[None, :]
    mid = u[:, None] - indice
    if scale < 1:
        weight = scale * _cubic(mid * scale)
    else:
        weight = _cubic(mid)
    weight = weight / jnp.sum(weight, axis=1, keepdims=True)
    indice = jnp.clip(indice, 1.0, float(in_size)).astype(jnp.int32)
    return weight, indice


def _resize_matrix(in_size, out_size, scale):
    """Dense (out_size, in_size) matrix equivalent to the gather + weighted sum."""
    weight, indice = _contribute_1d(in_size, out_size, scale)   # (out, P)
    rows = jnp.arange(out_size, dtype=jnp.int32)[:, None]
    mat = jnp.zeros((out_size, in_size), dtype=jnp.float32)
    mat = mat.at[rows, indice - 1].add(weight)
    return mat


# ---------------------------------------------------------------------------
# Kernels
# ---------------------------------------------------------------------------
def _folded_resize_kernel(x_ref, w0_ref, w1t_ref, o_ref, *, w_first):
    # x_ref: (1, h, T*w)   lane-folded batch;   w1t_ref: (T*w, T*out_w) block-diag.
    x = x_ref[0]
    w0 = w0_ref[...]
    w1t = w1t_ref[...]
    if w_first:
        t1 = jnp.dot(x, w1t, preferred_element_type=jnp.float32)        # (h, T*out_w)
        out = jnp.dot(w0, t1.astype(w0.dtype),
                      preferred_element_type=jnp.float32)               # (out_h, T*out_w)
    else:
        t1 = jnp.dot(w0, x, preferred_element_type=jnp.float32)         # (out_h, T*w)
        out = jnp.dot(t1.astype(w1t.dtype), w1t,
                      preferred_element_type=jnp.float32)               # (out_h, T*out_w)
    o_ref[0] = out.astype(o_ref.dtype)


def _direct_resize_kernel(x_ref, w0_ref, w1t_ref, o_ref, *, w_first):
    # x_ref: (T, h, w); o_ref: (T, out_h, out_w) -- lane-dense per-image stores.
    t_bc = x_ref.shape[0]
    w0 = w0_ref[...]
    w1t = w1t_ref[...]
    for t in range(t_bc):     # static unroll; each store is a full image plane
        xt = x_ref[t]
        if w_first:
            t1 = jnp.dot(xt, w1t, preferred_element_type=jnp.float32)
            out = jnp.dot(w0, t1.astype(w0.dtype), preferred_element_type=jnp.float32)
        else:
            t1 = jnp.dot(w0, xt, preferred_element_type=jnp.float32)
            out = jnp.dot(t1.astype(w1t.dtype), w1t, preferred_element_type=jnp.float32)
        o_ref[t] = out.astype(o_ref.dtype)


# ---------------------------------------------------------------------------
# Wrapper
# ---------------------------------------------------------------------------
_LANE = 128
_MXU_TARGET = 256        # big-matmul-dim fill target (v6e/v7x MXU; v5e runs 2 passes)


def _vmem_cap_bytes():
    try:
        cap = int(pltpu.get_tpu_info().vmem_capacity_bytes)
    except Exception:
        cap = 64 * 2 ** 20          # conservative: v7x per-TC VMEM
    return min(int(cap * 0.85), 100 * 2 ** 20)


def _const_weight_spec(shape, single_buffer):
    index_map = lambda i: (0,) * len(shape)
    if single_buffer:
        # Constant-index block is revisited every step (no re-DMA); single-buffering
        # halves its VMEM footprint.  Silent fallback keeps portability.
        try:
            return pl.BlockSpec(shape, index_map, pipeline_mode=pl.Buffered(1))
        except Exception:
            pass
    return pl.BlockSpec(shape, index_map)


def bicubic_imresize(x, scale, *, images_per_step=None, compute_dtype=jnp.float32):
    """MATLAB-style bicubic resize of NCHW `x` by `scale` via Pallas TPU matmuls.

    compute_dtype=jnp.bfloat16 feeds the MXU bf16 (f32 accumulate): much higher MXU
    throughput and half the DMA on v6e/v7x, at ~1e-2 relative error (opt-in).
    """
    if x.ndim == 3:
        x = x[None]
    b, c, h, w = x.shape
    out_h = int(h * scale)          # int() truncation, matching the reference module
    out_w = int(w * scale)
    bc = b * c

    cdt = jnp.dtype(compute_dtype)
    csz = cdt.itemsize
    osz = jnp.dtype(x.dtype).itemsize

    w0_f32 = _resize_matrix(h, out_h, scale)          # (out_h, h)
    w1t_f32 = _resize_matrix(w, out_w, scale).T       # (w, out_w)
    w0 = w0_f32.astype(cdt)

    cap = _vmem_cap_bytes()
    budget = int(cap * 0.6)         # per-step working-set target (pipeline headroom)

    # ---- per-step working-set estimates (bytes) -------------------------------
    def folded_bytes(t):
        return (2 * h * t * w * csz                                   # x block (x2 buf)
                + 2 * out_h * t * out_w * osz                         # out block (x2 buf)
                + 2 * (out_h * h + (t * w) * (t * out_w)) * csz       # weights
                + (max(h, out_h) * t * max(w, out_w)
                   + out_h * t * out_w) * 4)                          # f32 temporaries

    def direct_bytes(t):
        return (2 * t * h * w * csz
                + 2 * t * out_h * out_w * osz
                + 2 * (out_h * h + w * out_w) * csz
                + 2 * (max(h * out_w, out_h * w) + out_h * out_w) * 4)

    def pick_t(target, est_fn):
        t = int(max(1, min(target, bc)))
        while t > 1 and est_fn(t) > budget:
            t -= 1
        return t

    # ---- choose images-per-step and kernel path --------------------------------
    use_folded = (out_w < _LANE) and bc >= 2
    if use_folded:
        if images_per_step is None:
            target = max(pl.cdiv(_MXU_TARGET, w), pl.cdiv(_MXU_TARGET, out_w))
            target = min(target, 64)
        else:
            target = images_per_step
        t_bc = pick_t(target, folded_bytes)
        use_folded = t_bc >= 2
    if not use_folded:
        target = images_per_step if images_per_step is not None else 8
        t_bc = pick_t(target, direct_bytes)

    num_tiles = pl.cdiv(bc, t_bc)
    bc_pad = num_tiles * t_bc

    x_flat = x.reshape(bc, h, w).astype(cdt)          # cast once, wrapper-side
    if bc_pad != bc:
        x_flat = jnp.pad(x_flat, ((0, bc_pad - bc), (0, 0), (0, 0)))

    if use_folded:
        # Small-image path: batch folded into lanes, block-diagonal W1^T.
        x_folded = (x_flat.reshape(num_tiles, t_bc, h, w)
                    .transpose(0, 2, 1, 3)
                    .reshape(num_tiles, h, t_bc * w))
        w1t_bd = jnp.kron(jnp.eye(t_bc, dtype=jnp.float32), w1t_f32).astype(cdt)

        flops_w_first = h * (t_bc * w) * (t_bc * out_w) + out_h * h * (t_bc * out_w)
        flops_h_first = out_h * h * (t_bc * w) + out_h * (t_bc * w) * (t_bc * out_w)
        w_first = flops_w_first <= flops_h_first

        vmem_limit = min(cap, max(int(folded_bytes(t_bc) * 1.4), 32 * 2 ** 20))
        kernel = functools.partial(_folded_resize_kernel, w_first=w_first)
        out_slab = pl.pallas_call(
            kernel,
            out_shape=jax.ShapeDtypeStruct((num_tiles, out_h, t_bc * out_w), x.dtype),
            grid_spec=pltpu.PrefetchScalarGridSpec(
                num_scalar_prefetch=0,
                grid=(num_tiles,),
                in_specs=[
                    pl.BlockSpec((1, h, t_bc * w), lambda i: (i, 0, 0)),
                    _const_weight_spec((out_h, h), False),
                    _const_weight_spec((t_bc * w, t_bc * out_w), False),
                ],
                out_specs=pl.BlockSpec((1, out_h, t_bc * out_w), lambda i: (i, 0, 0)),
            ),
            compiler_params=pltpu.CompilerParams(
                dimension_semantics=("parallel",),
                vmem_limit_bytes=vmem_limit),
        )(x_folded, w0, w1t_bd)

        out = (out_slab.reshape(num_tiles, out_h, t_bc, out_w)
               .transpose(0, 2, 1, 3)
               .reshape(bc_pad, out_h, out_w))[:bc]
    else:
        # Large-image / single-image path: store (t_bc, out_h, out_w) blocks directly
        # (no wrapper-side output transpose -> no extra HBM round trip).
        flops_w_first = h * w * out_w + out_h * h * out_w
        flops_h_first = out_h * h * w + out_h * w * out_w
        w_first = flops_w_first <= flops_h_first

        w1t = w1t_f32.astype(cdt)
        weight_bytes = (out_h * h + w * out_w) * csz
        single_buf = weight_bytes > (2 << 20)

        vmem_limit = min(cap, max(int(direct_bytes(t_bc) * 1.4), 32 * 2 ** 20))
        kernel = functools.partial(_direct_resize_kernel, w_first=w_first)
        out = pl.pallas_call(
            kernel,
            out_shape=jax.ShapeDtypeStruct((bc_pad, out_h, out_w), x.dtype),
            grid_spec=pltpu.PrefetchScalarGridSpec(
                num_scalar_prefetch=0,
                grid=(num_tiles,),
                in_specs=[
                    pl.BlockSpec((t_bc, h, w), lambda i: (i, 0, 0)),
                    _const_weight_spec((out_h, h), single_buf),
                    _const_weight_spec((w, out_w), single_buf),
                ],
                out_specs=pl.BlockSpec((t_bc, out_h, out_w), lambda i: (i, 0, 0)),
            ),
            compiler_params=pltpu.CompilerParams(
                dimension_semantics=("parallel",),
                vmem_limit_bytes=vmem_limit),
        )(x_flat, w0, w1t)
        out = out[:bc]

    return out.reshape(b, c, out_h, out_w)


# ---------------------------------------------------------------------------
# Self-test
# ---------------------------------------------------------------------------
if __name__ == "__main__":
    def _ref(x, scale):
        b_, c_, h_, w_ = x.shape
        w0r = _resize_matrix(h_, int(h_ * scale), scale)
        w1r = _resize_matrix(w_, int(w_ * scale), scale)
        return jnp.einsum("oh,bchw,pw->bcop", w0r, x, w1r,
                          precision=jax.lax.Precision.HIGHEST)

    # Case 1: small square upscale (lane-folded path, width-first order).
    key = jax.random.PRNGKey(0)
    b, c, h, w = 2, 4, 16, 16
    scale = 2.0
    x = jax.random.normal(key, (b, c, h, w), dtype=jnp.float32)
    out = jax.block_until_ready(bicubic_imresize(x, scale))
    assert out.shape == (b, c, 32, 32)
    assert jnp.allclose(out, _ref(x, scale), atol=1e-4, rtol=1e-4)

    # Case 2: non-square input, b*c=3 (lane-folded path, odd fold width).
    x2 = jax.random.normal(jax.random.PRNGKey(1), (1, 3, 24, 8), dtype=jnp.float32)
    out2 = jax.block_until_ready(bicubic_imresize(x2, 2.0))
    assert out2.shape == (1, 3, 48, 16)
    assert jnp.allclose(out2, _ref(x2, 2.0), atol=1e-3, rtol=1e-3)

    # Case 3: downscale (scale < 1 widens the bicubic kernel; height-first order).
    x3 = jax.random.normal(jax.random.PRNGKey(2), (2, 2, 32, 32), dtype=jnp.float32)
    out3 = jax.block_until_ready(bicubic_imresize(x3, 0.5))
    assert out3.shape == (2, 2, 16, 16)
    assert jnp.allclose(out3, _ref(x3, 0.5), atol=1e-3, rtol=1e-3)

    # Case 4: lane-dense image (direct path, no wrapper transpose).
    x4 = jax.random.normal(jax.random.PRNGKey(3), (1, 2, 128, 128), dtype=jnp.float32)
    out4 = jax.block_until_ready(bicubic_imresize(x4, 2.0))
    assert out4.shape == (1, 2, 256, 256)
    assert jnp.allclose(out4, _ref(x4, 2.0), atol=1e-3, rtol=1e-3)

    print("KERNEL_OK")
</pallas_src>

<mosaic_0001>
module attributes {stable_mosaic.version = 11 : i64} {
  func.func @_folded_resize_kernel(%arg0: i32, %arg1: memref<1x16x128xf32, #tpu.memory_space<vmem>>, %arg2: memref<32x16xf32, #tpu.memory_space<vmem>>, %arg3: memref<128x256xf32, #tpu.memory_space<vmem>>, %arg4: memref<1x32x256xf32, #tpu.memory_space<vmem>>) attributes {dimension_semantics = [#tpu.dimension_semantics<parallel>], iteration_bounds = array<i64: 1>, scalar_prefetch = 0 : i64, scratch_operands = 0 : i64, tpu.core_type = #tpu.core_type<tc>, window_params = [{transform_indices = @transform_0, window_bounds = array<i64: 1, 16, 128>}, {pipeline_mode = #tpu.pipeline_mode<synchronous>, transform_indices = @transform_1, window_bounds = array<i64: 32, 16>}, {pipeline_mode = #tpu.pipeline_mode<synchronous>, transform_indices = @transform_2, window_bounds = array<i64: 128, 256>}, {transform_indices = @transform_3, window_bounds = array<i64: 1, 32, 256>}]} {
    %c0 = arith.constant 0 : index
    %c0_0 = arith.constant 0 : index
    %c0_1 = arith.constant 0 : index
    %0 = vector.load %arg1[%c0, %c0_0, %c0_1] : memref<1x16x128xf32, #tpu.memory_space<vmem>>, vector<1x16x128xf32>
    %1 = vector.shape_cast %0 : vector<1x16x128xf32> to vector<16x128xf32>
    %c0_2 = arith.constant 0 : index
    %c0_3 = arith.constant 0 : index
    %2 = vector.load %arg2[%c0_2, %c0_3] : memref<32x16xf32, #tpu.memory_space<vmem>>, vector<32x16xf32>
    %c0_4 = arith.constant 0 : index
    %c0_5 = arith.constant 0 : index
    %3 = vector.load %arg3[%c0_4, %c0_5] : memref<128x256xf32, #tpu.memory_space<vmem>>, vector<128x256xf32>
    %cst = arith.constant dense<0.000000e+00> : vector<16x256xf32>
    %4 = tpu.matmul %1, %3, %cst {dimension_numbers = #tpu.dot_dimension_numbers<[1], [0], [0], [1], [0, 0, 1, 1], [], []>} : vector<16x128xf32>, vector<128x256xf32>, vector<16x256xf32> -> vector<16x256xf32>
    %cst_6 = arith.constant dense<0.000000e+00> : vector<32x256xf32>
    %5 = tpu.matmul %2, %4, %cst_6 {dimension_numbers = #tpu.dot_dimension_numbers<[1], [0], [0], [1], [0, 0, 1, 1], [], []>} : vector<32x16xf32>, vector<16x256xf32>, vector<32x256xf32> -> vector<32x256xf32>
    %c0_7 = arith.constant 0 : index
    %c0_8 = arith.constant 0 : index
    %c0_9 = arith.constant 0 : index
    %6 = vector.load %arg4[%c0_7, %c0_8, %c0_9] : memref<1x32x256xf32, #tpu.memory_space<vmem>>, vector<1x32x256xf32>
    %7 = vector.shape_cast %6 : vector<1x32x256xf32> to vector<32x256xf32>
    %8 = vector.shape_cast %5 : vector<32x256xf32> to vector<1x32x256xf32>
    tpu.vector_store %arg4[%c0_7, %c0_8, %c0_9], %8 {strides = array<i32>} : memref<1x32x256xf32, #tpu.memory_space<vmem>>, vector<1x32x256xf32>,
    return
  }
  func.func @transform_0(%arg0: i32) -> (i32, i32, i32) {
    %c0_i32 = arith.constant 0 : i32
    %c0_i32_0 = arith.constant 0 : i32
    %c0_i32_1 = arith.constant 0 : i32
    return %arg0, %c0_i32, %c0_i32_0 : i32, i32, i32
  }
  func.func @transform_1(%arg0: i32) -> (i32, i32) {
    %c0_i32 = arith.constant 0 : i32
    %c0_i32_0 = arith.constant 0 : i32
    %c0_i32_1 = arith.constant 0 : i32
    return %c0_i32, %c0_i32_0 : i32, i32
  }
  func.func @transform_2(%arg0: i32) -> (i32, i32) {
    %c0_i32 = arith.constant 0 : i32
    %c0_i32_0 = arith.constant 0 : i32
    %c0_i32_1 = arith.constant 0 : i32
    return %c0_i32, %c0_i32_0 : i32, i32
  }
  func.func @transform_3(%arg0: i32) -> (i32, i32, i32) {
    %c0_i32 = arith.constant 0 : i32
    %c0_i32_0 = arith.constant 0 : i32
    %c0_i32_1 = arith.constant 0 : i32
    return %arg0, %c0_i32, %c0_i32_0 : i32, i32, i32
  }
}

</mosaic_0001>

<bundles_post_ra>
// kernel: tpu_custom_call.1
= control target key start
LH: loop header
LB: loop body
LE: loop exit
PB: predicated region body
PF: predicated region fallthrough
CT: control target
= control target key end

     0   :  { %8 = vsyncpa [#allocation3], 0  ;;  %s331_s0 = inlined_call_operand.vmem [shape: f32[1,16,128], index: 0, kind: input, shape index: {}]   ;;  %s332_s1 = inlined_call_operand.vmem [shape: f32[32,16], index: 1, kind: input, shape index: {}]   ;;  %s333_s2 = inlined_call_operand.hbm [shape: f32[128,256], index: 2, kind: input, shape index: {}]   ;;  %s334_s3 = inlined_call_operand.hbm [shape: f32[1,32,256], index: 3, kind: output, shape index: {}]  }
   0x1   :  { %9 = vsyncpa [#allocation4], 0  ;;  %s18_s14 = sshll.u32 %s333_s2, 4  ;;  %s277_s15 = smov [#allocation2]   ;;  %s19_s14 = int_to_ptr.hbm [resolvable:$true] %s18_s14 }
   0x2   :  { %s20_s16 = sshll.u32 %s277_s15, 4  ;;  %s278_s17 = smov 256   ;;  %s21_s16 = int_to_ptr.vmem [resolvable:$true] %s20_s16 }
   0x3   :  { %s279_s18 = smov 16  }
   0x4   :  { %26 = dma.hbm_to_vmem [thread:$0]  %s19_s14, 4096, %s21_s16, [#allocation3], %s278_s17, %s278_s17, %s279_s18  }
   0x5   :  { %273 = dma.done.wait [#allocation3], 4096  }
   0x6   :  { %274 = vsyncadd [#allocation3], 4294963200  ;;  %v67_v0 = vld [vmem:[#allocation2 + $0xf0] sm:$0xff]  ;;  %v68_v1 = vld [vmem:[#allocation2 + $0xf8] sm:$0xff]  ;;  %vm115_vm0 = vcmask 130048   ;;  %s280_s29 = smov [#allocation5]  }
   0x7   :  { %v65_v2 = vld [vmem:[#allocation2 + $0xe0] sm:$0xff]  ;;  %69 = vmatpush.msra.mxu0 %v67_v0  ;;  %92 = vmatpush.msra.mxu1 %v68_v1  ;;  %v66_v3 = vld [vmem:[#allocation2 + $0xe8] sm:$0xff]  ;;  %v63_v4 = vld [vmem:[#allocation2 + $0xd0] sm:$0xff]  ;;  %s198_s30 = sshll.u32 %s280_s29, 4  ;;  %s199_s30 = int_to_ptr.vmem [resolvable:$true] %s198_s30 }
   0x8   :  { %v64_v5 = vld [vmem:[#allocation2 + $0xd8] sm:$0xff]  ;;  %v61_v6 = vld [vmem:[#allocation2 + $0xc0] sm:$0xff]  ;;  %v62_v7 = vld [vmem:[#allocation2 + $0xc8] sm:$0xff] }
   0x9   :  { %70 = vmatpush.msra.mxu0 %v65_v2  ;;  %93 = vmatpush.msra.mxu1 %v66_v3  ;;  %v59_v8 = vld [vmem:[#allocation2 + $0xb0] sm:$0xff]  ;;  %v60_v9 = vld [vmem:[#allocation2 + $0xb8] sm:$0xff]  ;;  %v57_v10 = vld [vmem:[#allocation2 + $0xa0] sm:$0xff] }
   0xa   :  { %v58_v11 = vld [vmem:[#allocation2 + $0xa8] sm:$0xff]  ;;  %v55_v12 = vld [vmem:[#allocation2 + $0x90] sm:$0xff]  ;;  %v56_v13 = vld [vmem:[#allocation2 + $0x98] sm:$0xff] }
   0xb   :  { %71 = vmatpush.msra.mxu0 %v63_v4  ;;  %94 = vmatpush.msra.mxu1 %v64_v5  ;;  %v53_v14 = vld [vmem:[#allocation2 + $0x80] sm:$0xff]  ;;  %v54_v15 = vld [vmem:[#allocation2 + $0x88] sm:$0xff]  ;;  %v51_v16 = vld [vmem:[#allocation2 + $0x70] sm:$0xff] }
   0xc   :  { %v52_v17 = vld [vmem:[#allocation2 + $0x78] sm:$0xff]  ;;  %v49_v18 = vld [vmem:[#allocation2 + $0x60] sm:$0xff]  ;;  %v50_v19 = vld [vmem:[#allocation2 + $0x68] sm:$0xff] }
   0xd   :  { %72 = vmatpush.msra.mxu0 %v61_v6  ;;  %95 = vmatpush.msra.mxu1 %v62_v7  ;;  %v47_v20 = vld [vmem:[#allocation2 + $0x50] sm:$0xff]  ;;  %v48_v21 = vld [vmem:[#allocation2 + $0x58] sm:$0xff]  ;;  %v45_v22 = vld [vmem:[#allocation2 + $0x40] sm:$0xff] }
   0xe   :  { %v46_v23 = vld [vmem:[#allocation2 + $0x48] sm:$0xff]  ;;  %v43_v24 = vld [vmem:[#allocation2 + $0x30] sm:$0xff]  ;;  %v44_v25 = vld [vmem:[#allocation2 + $0x38] sm:$0xff] }
   0xf   :  { %73 = vmatpush.msra.mxu0 %v59_v8  ;;  %96 = vmatpush.msra.mxu1 %v60_v9  ;;  %v41_v26 = vld [vmem:[#allocation2 + $0x20] sm:$0xff]  ;;  %v42_v27 = vld [vmem:[#allocation2 + $0x28] sm:$0xff]  ;;  %v39_v28 = vld [vmem:[#allocation2 + $0x10] sm:$0xff] }
  0x10   :  { %v40_v29 = vld [vmem:[#allocation2 + $0x18] sm:$0xff]  ;;  %v37_v30 = vld [vmem:[#allocation2] sm:$0xff]  ;;  %v38_v31 = vld [vmem:[#allocation2 + $0x8] sm:$0xff] }
  0x11   :  { %74 = vmatpush.msra.mxu0 %v57_v10  ;;  %97 = vmatpush.msra.mxu1 %v58_v11  ;;  %v31_v32 = vld [vmem:[%s331_s0] sm:$0xff]  ;;  %v32_v33 = vld [vmem:[%s331_s0 + $0x8] sm:$0xff]  ;;  %v35_v40 = vld [vmem:[%s332_s1 + $0x10] sm:$0xff] }
  0x12   :  { %v33_v38 = vld [vmem:[%s332_s1] sm:$0xff]  ;;  %v34_v39 = vld [vmem:[%s332_s1 + $0x8] sm:$0xff]  ;;  %v36_v41 = vld [vmem:[%s332_s1 + $0x18] sm:$0xff]  ;;  %s200_s1 = sshll.u32 %s334_s3, 4  ;;  %s201_s1 = int_to_ptr.hbm [resolvable:$true] %s200_s1 }
  0x13   :  { %75 = vmatpush.msra.mxu0 %v55_v12  ;;  %98 = vmatpush.msra.mxu1 %v56_v13 }
  0x15   :  { %76 = vmatpush.msra.mxu0 %v53_v14  ;;  %99 = vmatpush.msra.mxu1 %v54_v15 }
  0x17   :  { %77 = vmatpush.msra.mxu0 %v51_v16  ;;  %100 = vmatpush.msra.mxu1 %v52_v17 }
  0x19   :  { %78 = vmatpush.msra.mxu0 %v49_v18  ;;  %101 = vmatpush.msra.mxu1 %v50_v19 }
  0x1b   :  { %79 = vmatpush.msra.mxu0 %v47_v20  ;;  %102 = vmatpush.msra.mxu1 %v48_v21 }
  0x1d   :  { %80 = vmatpush.msra.mxu0 %v45_v22  ;;  %103 = vmatpush.msra.mxu1 %v46_v23 }
  0x1f   :  { %81 = vmatpush.msra.mxu0 %v43_v24  ;;  %104 = vmatpush.msra.mxu1 %v44_v25 }
  0x21   :  { %82 = vmatpush.msra.mxu0 %v41_v26  ;;  %105 = vmatpush.msra.mxu1 %v42_v27 }
  0x23   :  { %83 = vmatpush.msra.mxu0 %v39_v28  ;;  %106 = vmatpush.msra.mxu1 %v40_v29 }
  0x25   :  { %84 = vmatpush.msra.mxu0 %v37_v30  ;;  %107 = vmatpush.msra.mxu1 %v38_v31 }
  0x26   :  { %85 = vmatmul.f32.vlgmr.msra.gmra.mxu0 %v31_v32  ;;  %108 = vmatmul.f32.vlgmr.msra.gmra.mxu1 %v31_v32 }
  0x2e   :  { %88 = vmatmul.f32.gmra.mxu0 %v32_v33  ;;  %111 = vmatmul.f32.gmra.mxu1 %v32_v33 }
  0xa3   :  { %v86_v34 = vpop.f32.mrf.mxu0  ;;  %v109_v35 = vpop.f32.mrf.mxu1 }
  0xab   :  { %v89_v36 = vpop.f32.mrf.mxu0  ;;  %v112_v37 = vpop.f32.mrf.mxu1 }
  0xac   :  { %142 = vmatpush.msra.mxu2 %v89_v36  ;;  %171 = vmatpush.msra.mxu3 %v112_v37 }
  0xae   :  { %143 = vmatpush.msra.mxu2 %v86_v34  ;;  %172 = vmatpush.msra.mxu3 %v109_v35 }
  0xaf   :  { %213 = vmatmul.msk.f32.vlgmr.msra.gmra.mxu2 %vm115_vm0, %v33_v38  ;;  %217 = vmatmul.msk.f32.vlgmr.msra.gmra.mxu3 %vm115_vm0, %v33_v38 }
  0xb7   :  { %214 = vmatmul.msk.f32.gmra.mxu2 %vm115_vm0, %v34_v39  ;;  %218 = vmatmul.msk.f32.gmra.mxu3 %vm115_vm0, %v34_v39 }
  0xbf   :  { %215 = vmatmul.msk.f32.gmra.mxu2 %vm115_vm0, %v35_v40  ;;  %219 = vmatmul.msk.f32.gmra.mxu3 %vm115_vm0, %v35_v40 }
  0xc7   :  { %216 = vmatmul.msk.f32.gmra.mxu2 %vm115_vm0, %v36_v41  ;;  %220 = vmatmul.msk.f32.gmra.mxu3 %vm115_vm0, %v36_v41 }
 0x132   :  { %v145_v42 = vpop.f32.mrf.mxu2  ;;  %v174_v43 = vpop.f32.mrf.mxu3 }
 0x133   :  { %186 = vst [vmem:[#allocation5] sm:$0xff] %v145_v42 }
 0x134   :  { %187 = vst [vmem:[#allocation5 + $0x8] sm:$0xff] %v174_v43 }
 0x13a   :  { %v148_v44 = vpop.f32.mrf.mxu2  ;;  %v177_v45 = vpop.f32.mrf.mxu3 }
 0x13b   :  { %188 = vst [vmem:[#allocation5 + $0x10] sm:$0xff] %v148_v44 }
 0x13c   :  { %189 = vst [vmem:[#allocation5 + $0x18] sm:$0xff] %v177_v45 }
 0x142   :  { %v151_v46 = vpop.f32.mrf.mxu2  ;;  %v180_v47 = vpop.f32.mrf.mxu3 }
 0x143   :  { %190 = vst [vmem:[#allocation5 + $0x20] sm:$0xff] %v151_v46 }
 0x144   :  { %191 = vst [vmem:[#allocation5 + $0x28] sm:$0xff] %v180_v47 }
 0x14a   :  { %v154_v48 = vpop.f32.mrf.mxu2  ;;  %v183_v49 = vpop.f32.mrf.mxu3 }
 0x14b   :  { %192 = vst [vmem:[#allocation5 + $0x30] sm:$0xff] %v154_v48 }
 0x14c   :  { %193 = vst [vmem:[#allocation5 + $0x38] sm:$0xff] %v183_v49 }
 0x14d   :  { %206 = dma.vmem_to_hbm [thread:$0]  %s199_s30, 1024, %s201_s1, [#allocation4], %s278_s17, %s278_s17, %s279_s18  }
 0x14e   :  { %275 = dma.done.wait [#allocation4], 1024  }
 0x14f   :  { %276 = vsyncadd [#allocation4], 4294966272 }
 0x150   :  { %211 = vsyncpa [#allocation3], 1 }
 0x151   :  { %212 = vsyncpa [#allocation4], 1 }

</bundles_post_ra>
